<compile_context>
chip_gen: v7x
topology: tpu7x:2x2x1
jax: 0.10.0
libtpu: 0.0.40
codegen_flags: <defaults>
</compile_context>

<pallas_src>
import jax
import jax.numpy as jnp
from jax.experimental import pallas as pl
from jax.experimental.pallas import tpu as pltpu


def standard_nn_kernel(x_ref, w1_ref, b1_ref, w2_ref, b2_ref, o_ref):
    # x_ref:  (tB, 1)  batch tile of the input column
    # w1_ref: (1, H)   fc1.weight.T   (input_size == 1)
    # b1_ref: (1, H)   fc1.bias
    # w2_ref: (1, H)   fc2.weight     (output_size == 1)
    # b2_ref: (1, 1)   fc2.bias
    # o_ref:  (tB, 1)  batch tile of the output column
    x = x_ref[...]                                            # (tB, 1)

    # fc1 + ReLU: implicit (tB,1) x (1,H) broadcast, no materialized temporaries.
    h = jnp.maximum(x * w1_ref[...] + b1_ref[...], 0.0)       # (tB, H)

    # fc2: elementwise multiply then lane reduction over H (XLU), + bias.
    y = jnp.sum(h * w2_ref[...], axis=-1, keepdims=True) + b2_ref[...]  # (tB, 1)

    o_ref[...] = y.astype(o_ref.dtype)


def _round_up(a, m):
    return (a + m - 1) // m * m


def standard_nn_forward(x, w1, b1, w2, b2, *, block_b=512):
    """StandardNN forward: fc2(relu(fc1(x))).

    x:  (B, 1) f32
    w1: (H, 1) f32   fc1.weight
    b1: (H,)   f32   fc1.bias
    w2: (1, H) f32   fc2.weight
    b2: (1,)   f32   fc2.bias
    returns (B, 1) f32
    """
    B, I = x.shape
    H = w1.shape[0]
    assert I == 1 and w1.shape == (H, 1), "module spec has input_size == 1"
    assert w2.shape == (1, H) and b2.shape == (1,), "module spec has output_size == 1"

    # Batch tile: multiple of 8 (sublane constraint), capped at block_b so the
    # double-buffered tiles stay tiny in VMEM on every TPU generation.
    tB = block_b if B >= block_b else _round_up(B, 8)
    B_pad = _round_up(B, tB)

    x_p = x.astype(jnp.float32)
    if B_pad != B:
        x_p = jnp.pad(x_p, ((0, B_pad - B), (0, 0)))

    w1t = w1.reshape(1, H).astype(jnp.float32)   # == fc1.weight.T since input_size == 1
    b1r = b1.reshape(1, H).astype(jnp.float32)
    w2r = w2.reshape(1, H).astype(jnp.float32)
    b2r = b2.reshape(1, 1).astype(jnp.float32)

    grid = (B_pad // tB,)

    out = pl.pallas_call(
        standard_nn_kernel,
        out_shape=jax.ShapeDtypeStruct((B_pad, 1), jnp.float32),
        grid=grid,
        in_specs=[
            pl.BlockSpec((tB, 1), lambda i: (i, 0)),
            pl.BlockSpec((1, H), lambda i: (0, 0)),
            pl.BlockSpec((1, H), lambda i: (0, 0)),
            pl.BlockSpec((1, H), lambda i: (0, 0)),
            pl.BlockSpec((1, 1), lambda i: (0, 0)),
        ],
        out_specs=pl.BlockSpec((tB, 1), lambda i: (i, 0)),
        compiler_params=pltpu.CompilerParams(
            dimension_semantics=("parallel",),
        ),
    )(x_p, w1t, b1r, w2r, b2r)

    # TODO(synk): output last dim is 1 by module spec (output_size=1), so the
    # final store is lane-masked; can't make it lane-dense without changing layout.
    return out[:B]


def standard_nn_ref(x, w1, b1, w2, b2):
    """Pure-JAX reference mirroring the PyTorch forward."""
    h = jnp.maximum(x @ w1.T + b1[None, :], 0.0)
    return h @ w2.T + b2[None, :]


if __name__ == "__main__":
    input_size = 1
    hidden_size = 10
    output_size = 1
    batch = 8

    key = jax.random.PRNGKey(0)
    kx, kw1, kb1, kw2, kb2, kx2 = jax.random.split(key, 6)

    x = jax.random.normal(kx, (batch, input_size), dtype=jnp.float32)
    w1 = jax.random.normal(kw1, (hidden_size, input_size), dtype=jnp.float32)
    b1 = jax.random.normal(kb1, (hidden_size,), dtype=jnp.float32)
    w2 = jax.random.normal(kw2, (output_size, hidden_size), dtype=jnp.float32)
    b2 = jax.random.normal(kb2, (output_size,), dtype=jnp.float32)

    # Small demo shape (single grid step).
    out = jax.block_until_ready(standard_nn_forward(x, w1, b1, w2, b2))
    ref = standard_nn_ref(x, w1, b1, w2, b2)
    assert out.shape == (batch, output_size)
    assert jnp.allclose(out, ref, atol=1e-5, rtol=1e-5)

    # Exercise the multi-tile grid + batch-padding path with a small tile.
    x_big = jax.random.normal(kx2, (300, input_size), dtype=jnp.float32)
    out_big = jax.block_until_ready(
        standard_nn_forward(x_big, w1, b1, w2, b2, block_b=128)
    )
    ref_big = standard_nn_ref(x_big, w1, b1, w2, b2)
    assert out_big.shape == (300, output_size)
    assert jnp.allclose(out_big, ref_big, atol=1e-5, rtol=1e-5)

    print("KERNEL_OK")
</pallas_src>

<mosaic_0001>
module attributes {stable_mosaic.version = 11 : i64} {
  func.func @standard_nn_kernel(%arg0: i32, %arg1: memref<8x1xf32, #tpu.memory_space<vmem>>, %arg2: memref<1x10xf32, #tpu.memory_space<vmem>>, %arg3: memref<1x10xf32, #tpu.memory_space<vmem>>, %arg4: memref<1x10xf32, #tpu.memory_space<vmem>>, %arg5: memref<1x1xf32, #tpu.memory_space<vmem>>, %arg6: memref<8x1xf32, #tpu.memory_space<vmem>>) attributes {dimension_semantics = [#tpu.dimension_semantics<parallel>], iteration_bounds = array<i64: 1>, scalar_prefetch = 0 : i64, scratch_operands = 0 : i64, tpu.core_type = #tpu.core_type<tc>, window_params = [{transform_indices = @transform_0, window_bounds = array<i64: 8, 1>}, {pipeline_mode = #tpu.pipeline_mode<synchronous>, transform_indices = @transform_1, window_bounds = array<i64: 1, 10>}, {pipeline_mode = #tpu.pipeline_mode<synchronous>, transform_indices = @transform_2, window_bounds = array<i64: 1, 10>}, {pipeline_mode = #tpu.pipeline_mode<synchronous>, transform_indices = @transform_3, window_bounds = array<i64: 1, 10>}, {pipeline_mode = #tpu.pipeline_mode<synchronous>, transform_indices = @transform_4, window_bounds = array<i64: 1, 1>}, {transform_indices = @transform_5, window_bounds = array<i64: 8, 1>}]} {
    %c0 = arith.constant 0 : index
    %c0_0 = arith.constant 0 : index
    %0 = vector.load %arg1[%c0, %c0_0] : memref<8x1xf32, #tpu.memory_space<vmem>>, vector<8x1xf32>
    %c0_1 = arith.constant 0 : index
    %c0_2 = arith.constant 0 : index
    %1 = vector.load %arg2[%c0_1, %c0_2] : memref<1x10xf32, #tpu.memory_space<vmem>>, vector<1x10xf32>
    %2 = vector.broadcast %0 : vector<8x1xf32> to vector<8x10xf32>
    %3 = vector.broadcast %1 : vector<1x10xf32> to vector<8x10xf32>
    %4 = arith.mulf %2, %3 : vector<8x10xf32>
    %c0_3 = arith.constant 0 : index
    %c0_4 = arith.constant 0 : index
    %5 = vector.load %arg3[%c0_3, %c0_4] : memref<1x10xf32, #tpu.memory_space<vmem>>, vector<1x10xf32>
    %6 = vector.broadcast %5 : vector<1x10xf32> to vector<8x10xf32>
    %7 = arith.addf %4, %6 : vector<8x10xf32>
    %cst = arith.constant 0.000000e+00 : f32
    %8 = vector.broadcast %cst : f32 to vector<8x10xf32>
    %9 = arith.maximumf %7, %8 : vector<8x10xf32>
    %c0_5 = arith.constant 0 : index
    %c0_6 = arith.constant 0 : index
    %10 = vector.load %arg4[%c0_5, %c0_6] : memref<1x10xf32, #tpu.memory_space<vmem>>, vector<1x10xf32>
    %11 = vector.broadcast %10 : vector<1x10xf32> to vector<8x10xf32>
    %12 = arith.mulf %9, %11 : vector<8x10xf32>
    %cst_7 = arith.constant dense<0.000000e+00> : vector<8xf32>
    %13 = vector.multi_reduction <add>, %12, %cst_7 [1] : vector<8x10xf32> to vector<8xf32>
    %14 = vector.shape_cast %13 : vector<8xf32> to vector<8x1xf32>
    %c0_8 = arith.constant 0 : index
    %c0_9 = arith.constant 0 : index
    %15 = vector.load %arg5[%c0_8, %c0_9] : memref<1x1xf32, #tpu.memory_space<vmem>>, vector<1x1xf32>
    %16 = vector.broadcast %15 : vector<1x1xf32> to vector<8x1xf32>
    %17 = arith.addf %14, %16 : vector<8x1xf32>
    %c0_10 = arith.constant 0 : index
    %c0_11 = arith.constant 0 : index
    %18 = vector.load %arg6[%c0_10, %c0_11] : memref<8x1xf32, #tpu.memory_space<vmem>>, vector<8x1xf32>
    tpu.vector_store %arg6[%c0_10, %c0_11], %17 {strides = array<i32>} : memref<8x1xf32, #tpu.memory_space<vmem>>, vector<8x1xf32>,
    return
  }
  func.func @transform_0(%arg0: i32) -> (i32, i32) {
    %c0_i32 = arith.constant 0 : i32
    %c0_i32_0 = arith.constant 0 : i32
    return %arg0, %c0_i32 : i32, i32
  }
  func.func @transform_1(%arg0: i32) -> (i32, i32) {
    %c0_i32 = arith.constant 0 : i32
    %c0_i32_0 = arith.constant 0 : i32
    %c0_i32_1 = arith.constant 0 : i32
    return %c0_i32, %c0_i32_0 : i32, i32
  }
  func.func @transform_2(%arg0: i32) -> (i32, i32) {
    %c0_i32 = arith.constant 0 : i32
    %c0_i32_0 = arith.constant 0 : i32
    %c0_i32_1 = arith.constant 0 : i32
    return %c0_i32, %c0_i32_0 : i32, i32
  }
  func.func @transform_3(%arg0: i32) -> (i32, i32) {
    %c0_i32 = arith.constant 0 : i32
    %c0_i32_0 = arith.constant 0 : i32
    %c0_i32_1 = arith.constant 0 : i32
    return %c0_i32, %c0_i32_0 : i32, i32
  }
  func.func @transform_4(%arg0: i32) -> (i32, i32) {
    %c0_i32 = arith.constant 0 : i32
    %c0_i32_0 = arith.constant 0 : i32
    %c0_i32_1 = arith.constant 0 : i32
    return %c0_i32, %c0_i32_0 : i32, i32
  }
  func.func @transform_5(%arg0: i32) -> (i32, i32) {
    %c0_i32 = arith.constant 0 : i32
    %c0_i32_0 = arith.constant 0 : i32
    return %arg0, %c0_i32 : i32, i32
  }
}

</mosaic_0001>

<bundles_post_ra>
// kernel: tpu_custom_call.1
= control target key start
LH: loop header
LB: loop body
LE: loop exit
PB: predicated region body
PF: predicated region fallthrough
CT: control target
= control target key end

     0   :  { %v77_v0 = vmov 0   ;;  %vm53_vm0 = vcmask 80896   ;;  %vm65_vm1 = vcmask 7168   ;;  %s126_s0 = inlined_call_operand.vmem [shape: f32[8,1], index: 0, kind: input, shape index: {}]   ;;  %s127_s4 = inlined_call_operand.<no memory space> [shape: f32[1,1], index: 4, kind: input, shape index: {}]   ;;  %s128_s1 = inlined_call_operand.vmem [shape: f32[1,10], index: 1, kind: input, shape index: {}]   ;;  %s129_s2 = inlined_call_operand.vmem [shape: f32[1,10], index: 2, kind: input, shape index: {}]   ;;  %s130_s3 = inlined_call_operand.vmem [shape: f32[1,10], index: 3, kind: input, shape index: {}]   ;;  %s131_s5 = inlined_call_operand.vmem [shape: f32[8,1], index: 5, kind: output, shape index: {}]  }
   0x1   :  { %76 = vset.pattern.permute.xlu0 %v77_v0  ;;  %v22_v1 = vld [vmem:[%s126_s0] sm:$0xff]  ;;  %v10_v2 = vstv %s127_s4 }
   0x2   :  { %26 = vperm.xlu0 %76, %v22_v1   ;;  %11 = vst [vmem:[#allocation2] sm:$0x1] %v10_v2  ;;  %v71_v3 = vld [vmem:[%s128_s1] ss:$0 sm:$0xff] }
   0x3   :  { %v72_v4 = vld [vmem:[%s129_s2] ss:$0 sm:$0xff] }
   0x4   :  { %v73_v8 = vld [vmem:[%s130_s3] ss:$0 sm:$0xff] }
   0x9   :  { %v74_v12 = vld [vmem:[#allocation2] ss:$0 sm:$0xff] }
  0x81   :  { %v27_v5 = vpop.permute.xlu0 %26 }
  0x82   :  { %v35_v6 = vmul.f32 %v71_v3, %v27_v5 }
  0x84   :  { %v43_v7 = vadd.f32 %v72_v4, %v35_v6 }
  0x86   :  { %v44_v9 = vmax.f32 %v43_v7, 0.0 }
  0x88   :  { %v52_v10 = vmul.f32 %v73_v8, %v44_v9 }
  0x8a   :  { %v54_v11 = vsel %vm53_vm0, %v52_v10, 0.0 }
  0x8b   :  { %55 = vadd.xlane.f32.xlu0 %v54_v11 }
 0x118   :  { %v56_v13 = vpop.xlane.xlu0 %55 }
 0x119   :  { %v64_v14 = vadd.f32 %v74_v12, %v56_v13 }
 0x11b   :  { %66 = vst.msk [vmem:[%s131_s5] sm:$0xff] %vm65_vm1, %v64_v14 }

</bundles_post_ra>
